<compile_context>
chip_gen: v5e
topology: v5e:2x2
jax: 0.10.0
libtpu: 0.0.40
codegen_flags: <defaults>
</compile_context>

<pallas_src>
import functools

import numpy as np

import jax
import jax.numpy as jnp
from jax import lax
from jax.experimental import pallas as pl
from jax.experimental.pallas import tpu as pltpu


# --------------------- trace-time constant matrix builders -------------------

def _upsample_matrix(out_size, in_size):
    """Bilinear upsample (align_corners=True) along one axis as a dense matrix."""
    u = np.zeros((out_size, in_size), np.float32)
    if out_size == 1 or in_size == 1:
        u[:, 0] = 1.0
        return u
    scale = (in_size - 1) / (out_size - 1)
    for o in range(out_size):
        s = o * scale
        lo = min(int(np.floor(s)), in_size - 1)
        hi = min(lo + 1, in_size - 1)
        frac = s - lo
        u[o, lo] += 1.0 - frac
        u[o, hi] += frac
    return u


def _reflect_pad_matrix(size, pad):
    """ReflectionPad (no edge repeat) along one axis as a dense 0/1 matrix."""
    r = np.zeros((size + 2 * pad, size), np.float32)
    for j in range(size + 2 * pad):
        t = j - pad
        if t < 0:
            t = -t
        elif t >= size:
            t = 2 * size - 2 - t
        r[j, t] = 1.0
    return r


def _vmem_capacity_bytes():
    try:
        cap = getattr(pltpu.get_tpu_info(), "vmem_capacity_bytes", None)
        if cap:
            return int(cap)
    except Exception:
        pass
    return 128 * 1024 * 1024


# ------------------------------- Pallas kernel --------------------------------

def _fused_upconv_kernel(ph_ref, x_ref, m_ref, b_ref, o_ref, *,
                         kh_size, tile_h, negative_slope, apply_relu,
                         compute_dtype):
    # Grid = (col_tile j, batch b, row_tile t).
    # ph_ref: (Hop, Hi)  f32          H upsample+pad matrix (constant operand)
    # x_ref : (1, Hi, Wi*Cin)         input image (lane dim = W*Cin)
    # m_ref : (KH*Wi*Cin, TILE_N)     W upsample+pad folded with all conv taps
    # b_ref : (1, TILE_N)             bias tiled along W (f32)
    # o_ref : (1, tile_h, TILE_N)     lane-dense output tile
    tile_hw = tile_h + kh_size - 1
    t_idx = pl.program_id(2)
    start = pl.multiple_of(t_idx * tile_h, tile_h)       # 8-aligned (f32 rows)
    ph = ph_ref[pl.ds(start, tile_hw), :].astype(compute_dtype)

    # H-axis bilinear upsample + reflection pad for this row window (1 dot).
    # TODO(synk): for large Hi replace this dense dot with a VPU lerp
    # (two row reads + one FMA per output row); P_h has only 2 nnz per row.
    rows = jnp.dot(ph, x_ref[0], preferred_element_type=jnp.float32)

    # H-im2col slab: KH shifted row windows concatenated along lanes, so the
    # whole conv collapses to ONE dot with K = KH*Wi*Cin (fills the MXU K dim).
    slab = jnp.concatenate(
        [rows[kh:kh + tile_h, :] for kh in range(kh_size)], axis=1)
    slab = slab.astype(compute_dtype)

    y = jnp.dot(slab, m_ref[...], preferred_element_type=jnp.float32)
    y = y + b_ref[...]
    if apply_relu:
        y = jnp.where(y > 0, y, negative_slope * y)
    o_ref[...] = y[None].astype(o_ref.dtype)


# ------------------------------ module wrappers --------------------------------

def upsample_conv_layer_nhwc(x_nhwc, weight_oihw, bias, *, kernel_size,
                             upsample=2, relu=True,
                             compute_dtype=jnp.bfloat16,
                             tile_h=None, tile_n=None):
    """NHWC lane-dense fused forward. x_nhwc: (N, H, W, Cin) -> (N, Ho, Wo, Cout).

    Use this entry point inside an NHWC PyNET stack so consecutive layers skip
    the per-layer NCHW<->NHWC HBM round trips entirely.
    """
    n, hi, wi, cin = x_nhwc.shape
    cout, cin_w, kh_size, kw_size = weight_oihw.shape
    assert cin == cin_w and kernel_size == kh_size == kw_size
    pad = kernel_size // 2
    hu, wu = hi * upsample, wi * upsample
    hop, wop = hu + 2 * pad, wu + 2 * pad
    ho, wo = hop - kh_size + 1, wop - kw_size + 1
    assert pad < hu and pad < wu  # ReflectionPad2d requirement
    nc = wo * cout
    out_dtype = x_nhwc.dtype

    # Upsample + reflection pad as linear maps (trace-time numpy constants).
    p_h = _reflect_pad_matrix(hu, pad) @ _upsample_matrix(hu, hi)   # (hop, hi)
    p_w = _reflect_pad_matrix(wu, pad) @ _upsample_matrix(wu, wi)   # (wop, wi)

    # Fold the W-axis upsample+pad and ALL conv taps into ONE matrix:
    #   M[kh*Wi*Cin + w*Cin + ci, wo*Cout + co] = sum_kw p_w[wo+kw, w]*W[co,ci,kh,kw]
    # TODO(synk): the dense fold costs O(KH*Wi*Cin*Wo*Cout) bytes; for very wide
    # layers switch to a per-tap / im2col kernel instead.
    pw_taps = np.stack([p_w[kw:kw + wo] for kw in range(kw_size)])  # (KW, wo, wi)
    m = jnp.einsum('aov,ucha->hvcou', jnp.asarray(pw_taps),
                   weight_oihw.astype(jnp.float32))
    m_flat = m.reshape(kh_size * wi * cin, nc).astype(compute_dtype)

    # ---- output-column tiling (keeps VMEM independent of channel width) ----
    if tile_n is None:
        tile_n = nc
        if nc > 1024:
            for cand in range(1024, 127, -128):
                if nc % cand == 0:
                    tile_n = cand
                    break
    assert nc % tile_n == 0 and (tile_n == nc or tile_n % 128 == 0)
    num_j = nc // tile_n

    # ---- H row tiling: keep the f32 accumulator vreg-resident, keep the grid
    # deep enough for megacore pipelining, bound VMEM for large images. -------
    if tile_h is None:
        row_cap = min(128, max(8, (128 * 1024) // (tile_n * 4)))
        candidates = [c for c in range(8, min(row_cap, ho) + 1, 8) if ho % c == 0]
        if candidates:
            tile_h = max(candidates)
            while n * (ho // tile_h) < 8:          # v7x: >= ~4 steps per core
                smaller = [c for c in candidates if 16 <= c < tile_h]
                if not smaller:
                    break
                tile_h = max(smaller)
        else:
            tile_h = ho
    assert ho % tile_h == 0 and (tile_h == ho or tile_h % 8 == 0)
    num_t = ho // tile_h
    tile_hw = tile_h + kh_size - 1

    # Operands: lane dim carries W*Cin; P_h passed once (f32), sliced in-kernel.
    x2d = x_nhwc.reshape(n, hi, wi * cin).astype(compute_dtype)
    ph_c = jnp.asarray(p_h, jnp.float32)                       # (hop, hi)
    bias_row = jnp.tile(bias.astype(jnp.float32), wo).reshape(1, nc)

    kernel = functools.partial(
        _fused_upconv_kernel, kh_size=kh_size, tile_h=tile_h,
        negative_slope=0.2, apply_relu=relu, compute_dtype=compute_dtype)

    # Generation-aware VMEM limit from the (worst-case double-buffered) block
    # footprint, capped at 75% of physical VMEM (v7x: 64 MiB per TensorCore).
    esize = np.dtype(compute_dtype).itemsize
    oesize = np.dtype(out_dtype).itemsize
    block_bytes = (hop * hi * 4
                   + 2 * hi * wi * cin * esize
                   + 2 * kh_size * wi * cin * tile_n * esize
                   + 2 * tile_n * 4
                   + 2 * tile_h * tile_n * oesize)
    vmem_limit = int(min(int(0.75 * _vmem_capacity_bytes()),
                         max(block_bytes + (16 << 20), 32 << 20)))
    # TODO(synk): if block_bytes ever approaches 0.75*VMEM (very wide layers),
    # shrink tile_h / tile_n instead of relying on the margin.

    steps = num_j * n * num_t
    flops = (2 * steps * tile_hw * hi * wi * cin
             + 2 * n * ho * kh_size * wi * cin * nc)
    bytes_accessed = (hop * hi * 4
                      + num_j * n * hi * wi * cin * esize
                      + kh_size * wi * cin * nc * esize
                      + nc * 4
                      + n * ho * nc * oesize)

    def build(single_buffer_consts):
        const_mode = ({"pipeline_mode": pl.Buffered(1)}
                      if single_buffer_consts else {})
        mb_mode = const_mode if num_j == 1 else {}   # M/bias vary when num_j > 1
        return pl.pallas_call(
            kernel,
            out_shape=jax.ShapeDtypeStruct((n, ho, nc), out_dtype),
            grid_spec=pltpu.PrefetchScalarGridSpec(
                num_scalar_prefetch=0,
                grid=(num_j, n, num_t),
                in_specs=[
                    pl.BlockSpec((hop, hi), lambda j, b, t: (0, 0), **const_mode),
                    pl.BlockSpec((1, hi, wi * cin), lambda j, b, t: (b, 0, 0)),
                    pl.BlockSpec((kh_size * wi * cin, tile_n),
                                 lambda j, b, t: (0, j), **mb_mode),
                    pl.BlockSpec((1, tile_n), lambda j, b, t: (0, j), **mb_mode),
                ],
                out_specs=pl.BlockSpec((1, tile_h, tile_n),
                                       lambda j, b, t: (b, t, j)),
            ),
            compiler_params=pltpu.CompilerParams(
                dimension_semantics=("parallel", "parallel", "parallel"),
                vmem_limit_bytes=vmem_limit),
            cost_estimate=pl.CostEstimate(flops=int(flops), transcendentals=0,
                                          bytes_accessed=int(bytes_accessed)),
        )

    args = (ph_c, x2d, m_flat, bias_row)
    try:
        out2d = build(True)(*args)
    except Exception:
        # pl.Buffered(1) not supported by this jax version -> default buffering.
        out2d = build(False)(*args)

    return out2d.reshape(n, ho, wo, cout)


def upsample_conv_layer(x_nchw, weight_oihw, bias, *, kernel_size, upsample=2,
                        relu=True, compute_dtype=jnp.bfloat16,
                        tile_h=None, tile_n=None):
    """PyTorch-layout (NCHW) compatibility wrapper.

    NOTE: the two transposes here are full HBM round trips executed by XLA;
    inside a full PyNET stack call upsample_conv_layer_nhwc directly instead.
    """
    y = upsample_conv_layer_nhwc(
        jnp.transpose(x_nchw, (0, 2, 3, 1)), weight_oihw, bias,
        kernel_size=kernel_size, upsample=upsample, relu=relu,
        compute_dtype=compute_dtype, tile_h=tile_h, tile_n=tile_n)
    return jnp.transpose(y, (0, 3, 1, 2))


# ------------------------- pure-JAX reference (validation) ---------------------

def _bilinear_upsample_ref(x_nhwc, scale=2):
    n, h, w, c = x_nhwc.shape
    ho, wo = h * scale, w * scale

    def src_coords(out_size, in_size):
        if out_size == 1 or in_size == 1:
            z = jnp.zeros((out_size,), jnp.int32)
            return z, z, jnp.zeros((out_size,), jnp.float32)
        s = jnp.arange(out_size, dtype=jnp.float32) * (in_size - 1) / (out_size - 1)
        lo = jnp.floor(s).astype(jnp.int32)
        hi = jnp.minimum(lo + 1, in_size - 1)
        return lo, hi, s - lo.astype(jnp.float32)

    y0, y1, wy = src_coords(ho, h)
    x0, x1, wx = src_coords(wo, w)
    rows = (x_nhwc[:, y0, :, :] * (1.0 - wy)[None, :, None, None]
            + x_nhwc[:, y1, :, :] * wy[None, :, None, None])
    out = (rows[:, :, x0, :] * (1.0 - wx)[None, None, :, None]
           + rows[:, :, x1, :] * wx[None, None, :, None])
    return out.astype(x_nhwc.dtype)


def upsample_conv_layer_ref(x_nchw, weight_oihw, bias, *, kernel_size,
                            upsample=2, relu=True):
    pad = kernel_size // 2
    x = jnp.transpose(x_nchw, (0, 2, 3, 1))
    x = _bilinear_upsample_ref(x, scale=upsample)
    x = jnp.pad(x, ((0, 0), (pad, pad), (pad, pad), (0, 0)), mode="reflect")
    w_hwio = jnp.transpose(weight_oihw, (2, 3, 1, 0))
    y = lax.conv_general_dilated(
        x, w_hwio, window_strides=(1, 1), padding="VALID",
        dimension_numbers=("NHWC", "HWIO", "NHWC"))
    y = y + bias[None, None, None, :]
    if relu:
        y = jnp.where(y > 0, y, 0.2 * y)
    return jnp.transpose(y, (0, 3, 1, 2))


if __name__ == "__main__":
    # UpsampleConvLayer(in_channels=4, out_channels=8, kernel_size=3, upsample=2)
    N, Cin, H, W = 2, 4, 16, 16
    Cout, K = 8, 3

    key = jax.random.PRNGKey(0)
    kx, kw_, kb = jax.random.split(key, 3)
    x = jax.random.normal(kx, (N, Cin, H, W), dtype=jnp.float32)
    fan_in = Cin * K * K
    bound = 1.0 / (fan_in ** 0.5)
    weight = jax.random.uniform(kw_, (Cout, Cin, K, K), jnp.float32,
                                minval=-bound, maxval=bound)
    bias = jax.random.uniform(kb, (Cout,), jnp.float32,
                              minval=-bound, maxval=bound)

    ref = upsample_conv_layer_ref(x, weight, bias, kernel_size=K, upsample=2,
                                  relu=True)

    # Default path: bf16 MXU operands / f32 accumulate, auto tiles
    # (single column tile -> M/bias/P_h single-buffered).  bf16 operands set
    # the tolerance; accumulation is f32.
    out_bf16 = upsample_conv_layer(x, weight, bias, kernel_size=K, upsample=2,
                                   relu=True)
    out_bf16 = jax.block_until_ready(out_bf16)
    assert out_bf16.shape == (N, Cout, H * 2, W * 2), out_bf16.shape
    assert jnp.allclose(out_bf16, ref, atol=5e-2, rtol=5e-2), \
        float(jnp.max(jnp.abs(out_bf16 - ref)))

    # f32-operand path with explicit row + column tiling (exercises num_t > 1
    # and the Wo*Cout grid axis with num_j > 1); tight tolerance.
    out_f32 = upsample_conv_layer(x, weight, bias, kernel_size=K, upsample=2,
                                  relu=True, compute_dtype=jnp.float32,
                                  tile_h=8, tile_n=128)
    out_f32 = jax.block_until_ready(out_f32)
    assert out_f32.shape == (N, Cout, H * 2, W * 2), out_f32.shape
    assert jnp.allclose(out_f32, ref, atol=1e-4, rtol=1e-4), \
        float(jnp.max(jnp.abs(out_f32 - ref)))

    print("KERNEL_OK")
</pallas_src>

<mosaic_0001>
module attributes {stable_mosaic.version = 11 : i64} {
  func.func @_fused_upconv_kernel(%arg0: i32, %arg1: i32, %arg2: i32, %arg3: memref<34x16xf32, #tpu.memory_space<vmem>>, %arg4: memref<1x16x64xbf16, #tpu.memory_space<vmem>>, %arg5: memref<192x256xbf16, #tpu.memory_space<vmem>>, %arg6: memref<1x256xf32, #tpu.memory_space<vmem>>, %arg7: memref<1x16x256xf32, #tpu.memory_space<vmem>>) attributes {dimension_semantics = [#tpu.dimension_semantics<parallel>, #tpu.dimension_semantics<parallel>, #tpu.dimension_semantics<parallel>], iteration_bounds = array<i64: 1, 2, 2>, scalar_prefetch = 0 : i64, scratch_operands = 0 : i64, tpu.core_type = #tpu.core_type<tc>, window_params = [{pipeline_mode = #tpu.pipeline_mode<synchronous>, transform_indices = @transform_0, window_bounds = array<i64: 34, 16>}, {transform_indices = @transform_1, window_bounds = array<i64: 1, 16, 64>}, {pipeline_mode = #tpu.pipeline_mode<synchronous>, transform_indices = @transform_2, window_bounds = array<i64: 192, 256>}, {pipeline_mode = #tpu.pipeline_mode<synchronous>, transform_indices = @transform_3, window_bounds = array<i64: 1, 256>}, {transform_indices = @transform_4, window_bounds = array<i64: 1, 16, 256>}]} {
    %c16_i32 = arith.constant 16 : i32
    %0 = arith.muli %arg2, %c16_i32 : i32
    %1 = tpu.assume_multiple %0, 16 : i32
    %2 = arith.index_cast %1 : i32 to index
    %c0 = arith.constant 0 : index
    %3 = vector.load %arg3[%2, %c0] : memref<34x16xf32, #tpu.memory_space<vmem>>, vector<18x16xf32>
    %4 = arith.truncf %3 : vector<18x16xf32> to vector<18x16xbf16>
    %c0_0 = arith.constant 0 : index
    %c0_1 = arith.constant 0 : index
    %c0_2 = arith.constant 0 : index
    %5 = vector.load %arg4[%c0_0, %c0_1, %c0_2] : memref<1x16x64xbf16, #tpu.memory_space<vmem>>, vector<1x16x64xbf16>
    %6 = vector.shape_cast %5 : vector<1x16x64xbf16> to vector<16x64xbf16>
    %cst = arith.constant dense<0.000000e+00> : vector<18x64xf32>
    %7 = tpu.matmul %4, %6, %cst {dimension_numbers = #tpu.dot_dimension_numbers<[1], [0], [0], [1], [0, 0, 1, 1], [], []>} : vector<18x16xbf16>, vector<16x64xbf16>, vector<18x64xf32> -> vector<18x64xf32>
    %8 = vector.extract_strided_slice %7 {offsets = [0, 0], sizes = [16, 64], strides = [1, 1]} : vector<18x64xf32> to vector<16x64xf32>
    %9 = vector.extract_strided_slice %7 {offsets = [1, 0], sizes = [16, 64], strides = [1, 1]} : vector<18x64xf32> to vector<16x64xf32>
    %10 = vector.extract_strided_slice %7 {offsets = [2, 0], sizes = [16, 64], strides = [1, 1]} : vector<18x64xf32> to vector<16x64xf32>
    %11 = tpu.concatenate %8, %9, %10 in 1 : vector<16x64xf32>, vector<16x64xf32>, vector<16x64xf32> -> vector<16x192xf32>
    %12 = arith.truncf %11 : vector<16x192xf32> to vector<16x192xbf16>
    %c0_3 = arith.constant 0 : index
    %c0_4 = arith.constant 0 : index
    %13 = vector.load %arg5[%c0_3, %c0_4] : memref<192x256xbf16, #tpu.memory_space<vmem>>, vector<192x256xbf16>
    %cst_5 = arith.constant dense<0.000000e+00> : vector<16x256xf32>
    %14 = tpu.matmul %12, %13, %cst_5 {dimension_numbers = #tpu.dot_dimension_numbers<[1], [0], [0], [1], [0, 0, 1, 1], [], []>} : vector<16x192xbf16>, vector<192x256xbf16>, vector<16x256xf32> -> vector<16x256xf32>
    %c0_6 = arith.constant 0 : index
    %c0_7 = arith.constant 0 : index
    %15 = vector.load %arg6[%c0_6, %c0_7] : memref<1x256xf32, #tpu.memory_space<vmem>>, vector<1x256xf32>
    %16 = vector.broadcast %15 : vector<1x256xf32> to vector<16x256xf32>
    %17 = arith.addf %14, %16 : vector<16x256xf32>
    %cst_8 = arith.constant 0.000000e+00 : f32
    %18 = vector.broadcast %cst_8 : f32 to vector<16x256xf32>
    %19 = arith.cmpf ogt, %17, %18 : vector<16x256xf32>
    %cst_9 = arith.constant 2.000000e-01 : f32
    %20 = vector.broadcast %cst_9 : f32 to vector<16x256xf32>
    %21 = arith.mulf %20, %17 : vector<16x256xf32>
    %22 = arith.select %19, %17, %21 : vector<16x256xi1>, vector<16x256xf32>
    %23 = vector.shape_cast %22 : vector<16x256xf32> to vector<1x16x256xf32>
    %c0_10 = arith.constant 0 : index
    %c0_11 = arith.constant 0 : index
    %c0_12 = arith.constant 0 : index
    %24 = vector.load %arg7[%c0_10, %c0_11, %c0_12] : memref<1x16x256xf32, #tpu.memory_space<vmem>>, vector<1x16x256xf32>
    tpu.vector_store %arg7[%c0_10, %c0_11, %c0_12], %23 {strides = array<i32>} : memref<1x16x256xf32, #tpu.memory_space<vmem>>, vector<1x16x256xf32>,
    return
  }
  func.func @transform_0(%arg0: i32, %arg1: i32, %arg2: i32) -> (i32, i32) {
    %c0_i32 = arith.constant 0 : i32
    %c0_i32_0 = arith.constant 0 : i32
    %c0_i32_1 = arith.constant 0 : i32
    return %c0_i32, %c0_i32_0 : i32, i32
  }
  func.func @transform_1(%arg0: i32, %arg1: i32, %arg2: i32) -> (i32, i32, i32) {
    %c0_i32 = arith.constant 0 : i32
    %c0_i32_0 = arith.constant 0 : i32
    %c0_i32_1 = arith.constant 0 : i32
    return %arg1, %c0_i32, %c0_i32_0 : i32, i32, i32
  }
  func.func @transform_2(%arg0: i32, %arg1: i32, %arg2: i32) -> (i32, i32) {
    %c0_i32 = arith.constant 0 : i32
    %c0_i32_0 = arith.constant 0 : i32
    return %c0_i32, %arg0 : i32, i32
  }
  func.func @transform_3(%arg0: i32, %arg1: i32, %arg2: i32) -> (i32, i32) {
    %c0_i32 = arith.constant 0 : i32
    %c0_i32_0 = arith.constant 0 : i32
    return %c0_i32, %arg0 : i32, i32
  }
  func.func @transform_4(%arg0: i32, %arg1: i32, %arg2: i32) -> (i32, i32, i32) {
    %c0_i32 = arith.constant 0 : i32
    return %arg1, %arg2, %arg0 : i32, i32, i32
  }
}

module attributes {stable_mosaic.version = 11 : i64} {
  func.func @_fused_upconv_kernel(%arg0: i32, %arg1: i32, %arg2: i32, %arg3: memref<34x16xf32, #tpu.memory_space<vmem>>, %arg4: memref<1x16x64xbf16, #tpu.memory_space<vmem>>, %arg5: memref<192x256xbf16, #tpu.memory_space<vmem>>, %arg6: memref<1x256xf32, #tpu.memory_space<vmem>>, %arg7: memref<1x16x256xf32, #tpu.memory_space<vmem>>) attributes {dimension_semantics = [#tpu.dimension_semantics<parallel>, #tpu.dimension_semantics<parallel>, #tpu.dimension_semantics<parallel>], iteration_bounds = array<i64: 1, 2, 2>, scalar_prefetch = 0 : i64, scratch_operands = 0 : i64, tpu.core_type = #tpu.core_type<tc>, window_params = [{pipeline_mode = #tpu.pipeline_mode<synchronous>, transform_indices = @transform_0, window_bounds = array<i64: 34, 16>}, {transform_indices = @transform_1, window_bounds = array<i64: 1, 16, 64>}, {transform_indices = @transform_2, window_bounds = array<i64: 192, 256>}, {transform_indices = @transform_3, window_bounds = array<i64: 1, 256>}, {transform_indices = @transform_4, window_bounds = array<i64: 1, 16, 256>}]} {
    %c16_i32 = arith.constant 16 : i32
    %0 = arith.muli %arg2, %c16_i32 : i32
    %1 = tpu.assume_multiple %0, 16 : i32
    %2 = arith.index_cast %1 : i32 to index
    %c0 = arith.constant 0 : index
    %3 = vector.load %arg3[%2, %c0] : memref<34x16xf32, #tpu.memory_space<vmem>>, vector<18x16xf32>
    %4 = arith.truncf %3 : vector<18x16xf32> to vector<18x16xbf16>
    %c0_0 = arith.constant 0 : index
    %c0_1 = arith.constant 0 : index
    %c0_2 = arith.constant 0 : index
    %5 = vector.load %arg4[%c0_0, %c0_1, %c0_2] : memref<1x16x64xbf16, #tpu.memory_space<vmem>>, vector<1x16x64xbf16>
    %6 = vector.shape_cast %5 : vector<1x16x64xbf16> to vector<16x64xbf16>
    %cst = arith.constant dense<0.000000e+00> : vector<18x64xf32>
    %7 = tpu.matmul %4, %6, %cst {dimension_numbers = #tpu.dot_dimension_numbers<[1], [0], [0], [1], [0, 0, 1, 1], [], []>} : vector<18x16xbf16>, vector<16x64xbf16>, vector<18x64xf32> -> vector<18x64xf32>
    %8 = vector.extract_strided_slice %7 {offsets = [0, 0], sizes = [16, 64], strides = [1, 1]} : vector<18x64xf32> to vector<16x64xf32>
    %9 = vector.extract_strided_slice %7 {offsets = [1, 0], sizes = [16, 64], strides = [1, 1]} : vector<18x64xf32> to vector<16x64xf32>
    %10 = vector.extract_strided_slice %7 {offsets = [2, 0], sizes = [16, 64], strides = [1, 1]} : vector<18x64xf32> to vector<16x64xf32>
    %11 = tpu.concatenate %8, %9, %10 in 1 : vector<16x64xf32>, vector<16x64xf32>, vector<16x64xf32> -> vector<16x192xf32>
    %12 = arith.truncf %11 : vector<16x192xf32> to vector<16x192xbf16>
    %c0_3 = arith.constant 0 : index
    %c0_4 = arith.constant 0 : index
    %13 = vector.load %arg5[%c0_3, %c0_4] : memref<192x256xbf16, #tpu.memory_space<vmem>>, vector<192x256xbf16>
    %cst_5 = arith.constant dense<0.000000e+00> : vector<16x256xf32>
    %14 = tpu.matmul %12, %13, %cst_5 {dimension_numbers = #tpu.dot_dimension_numbers<[1], [0], [0], [1], [0, 0, 1, 1], [], []>} : vector<16x192xbf16>, vector<192x256xbf16>, vector<16x256xf32> -> vector<16x256xf32>
    %c0_6 = arith.constant 0 : index
    %c0_7 = arith.constant 0 : index
    %15 = vector.load %arg6[%c0_6, %c0_7] : memref<1x256xf32, #tpu.memory_space<vmem>>, vector<1x256xf32>
    %16 = vector.broadcast %15 : vector<1x256xf32> to vector<16x256xf32>
    %17 = arith.addf %14, %16 : vector<16x256xf32>
    %cst_8 = arith.constant 0.000000e+00 : f32
    %18 = vector.broadcast %cst_8 : f32 to vector<16x256xf32>
    %19 = arith.cmpf ogt, %17, %18 : vector<16x256xf32>
    %cst_9 = arith.constant 2.000000e-01 : f32
    %20 = vector.broadcast %cst_9 : f32 to vector<16x256xf32>
    %21 = arith.mulf %20, %17 : vector<16x256xf32>
    %22 = arith.select %19, %17, %21 : vector<16x256xi1>, vector<16x256xf32>
    %23 = vector.shape_cast %22 : vector<16x256xf32> to vector<1x16x256xf32>
    %c0_10 = arith.constant 0 : index
    %c0_11 = arith.constant 0 : index
    %c0_12 = arith.constant 0 : index
    %24 = vector.load %arg7[%c0_10, %c0_11, %c0_12] : memref<1x16x256xf32, #tpu.memory_space<vmem>>, vector<1x16x256xf32>
    tpu.vector_store %arg7[%c0_10, %c0_11, %c0_12], %23 {strides = array<i32>} : memref<1x16x256xf32, #tpu.memory_space<vmem>>, vector<1x16x256xf32>,
    return
  }
  func.func @transform_0(%arg0: i32, %arg1: i32, %arg2: i32) -> (i32, i32) {
    %c0_i32 = arith.constant 0 : i32
    %c0_i32_0 = arith.constant 0 : i32
    %c0_i32_1 = arith.constant 0 : i32
    return %c0_i32, %c0_i32_0 : i32, i32
  }
  func.func @transform_1(%arg0: i32, %arg1: i32, %arg2: i32) -> (i32, i32, i32) {
    %c0_i32 = arith.constant 0 : i32
    %c0_i32_0 = arith.constant 0 : i32
    %c0_i32_1 = arith.constant 0 : i32
    return %arg1, %c0_i32, %c0_i32_0 : i32, i32, i32
  }
  func.func @transform_2(%arg0: i32, %arg1: i32, %arg2: i32) -> (i32, i32) {
    %c0_i32 = arith.constant 0 : i32
    %c0_i32_0 = arith.constant 0 : i32
    return %c0_i32, %arg0 : i32, i32
  }
  func.func @transform_3(%arg0: i32, %arg1: i32, %arg2: i32) -> (i32, i32) {
    %c0_i32 = arith.constant 0 : i32
    %c0_i32_0 = arith.constant 0 : i32
    return %c0_i32, %arg0 : i32, i32
  }
  func.func @transform_4(%arg0: i32, %arg1: i32, %arg2: i32) -> (i32, i32, i32) {
    %c0_i32 = arith.constant 0 : i32
    return %arg1, %arg2, %arg0 : i32, i32, i32
  }
}

</mosaic_0001>

<bundles_post_ra>
// kernel: tpu_custom_call.1
= control target key start
LH: loop header
LB: loop body
LE: loop exit
PB: predicated region body
PF: predicated region fallthrough
CT: control target
= control target key end

     0   :  { %9 = vsyncpa [#allocation3], 0  ;;  %s1261_s0 = inlined_call_operand.vmem [shape: f32[34,16], index: 0, kind: input, shape index: {}]   ;;  %s1262_s1 = inlined_call_operand.vmem [shape: bf16[2,16,64], index: 1, kind: input, shape index: {}]   ;;  %s1263_s2 = inlined_call_operand.hbm [shape: bf16[192,256], index: 2, kind: input, shape index: {}]   ;;  %s1264_s3 = inlined_call_operand.vmem [shape: f32[1,256], index: 3, kind: input, shape index: {}]   ;;  %s1265_s4 = inlined_call_operand.hbm [shape: f32[2,32,256], index: 4, kind: output, shape index: {}]  }
   0x1   :  { %10 = vsyncpa [#allocation4], 0 }
   0x2   :  { %12 = vsyncpa [#allocation4 + $0x1], 0  ;;  %s1093_s15 = smov 0   ;;  %s1095_s16 = smov 0  }
   0x3   :  { %s1097_s17 = smov 0   ;;  %s1099_s18 = smov 0  }
   0x4   :  { %s1101_s19 = smov 0   ;;  %s1103_s20 = smov 0  }
   0x5   :  { %s1105_s21 = smov 0   ;;  %s1107_s22 = smov 0  }
   0x6 LB: > { %s690_s23 = sadd.s32 4294967295, %s1060_s22   ;;  %s691_s24 = sadd.s32 4294967294, %s1060_s22   ;;  %s1060_s22 = sphi %s1107_s22, %s18_s22   ;;  %s1056_s21 = sphi %s1105_s21, %s1276_s21   ;;  %s1052_s20 = sphi %s1103_s20, %s1275_s20   ;;  %s1048_s19 = sphi %s1101_s19, %s1274_s19   ;;  %s1044_s18 = sphi %s1099_s18, %s1273_s18   ;;  %s1040_s17 = sphi %s1097_s17, %s1272_s17   ;;  %s1036_s16 = sphi %s1095_s16, %s1271_s16   ;;  %s1032_s15 = sphi %s1093_s15, %s1270_s15  }
   0x7   : > { %s30_s25 = sadd.s32 1, %s1052_s20  ;;  %s33_s26 = sadd.s32 1, %s1056_s21 }
   0x8   : > { %p31_p0 = scmp.ge.s32.totalorder %s30_s25, 2  ;;  %s147_s27 = sadd.s32 1, %s1040_s17 }
   0x9   : > { %p157_p1 = scmp.ne.s32.totalorder %s1040_s17, %s1036_s16  ;;  %p158_p2 = scmp.eq.s32.totalorder %s690_s23, 3 }
   0xa   : > { %s1278_s25 = smov (%p31_p0, %s30_s25), 0  ;;  %s1280_s26 = smov (!%p31_p0, %s33_s26), %s1056_s21 }
   0xb   : > { %s141_s28 = ssub.s32 %s1052_s20, %s1278_s25  ;;  %p1145_p3 = por %p158_p2, %p157_p1 }
   0xc   : > { %p35_p4 = scmp.ge.s32.totalorder %s1280_s26, 2  ;;  %p163_p5 = scmp.ne.s32.totalorder %s1036_s16, %s1032_s15 }
   0xd   : > { %p164_p6 = scmp.eq.s32.totalorder %s691_s24, 3  ;;  %p692_p7 = scmp.ge.s32.totalorder %s1060_s22, 1 }
   0xe   : > { %s1282_s26 = smov (%p35_p4, %s1280_s26), 0  ;;  %p171_p9 = scmp.lt.s32.totalorder %s1060_s22, 5 }
   0xf   : > { %p1154_p8 = por %p164_p6, %p163_p5  ;;  %s140_s5 = ssub.s32 %s1056_s21, %s1282_s26 }
  0x10   : > { %s142_s6 = sor.u32 %s141_s28, %s140_s5  ;;  %p1161_p10 = pnand %p692_p7, %p171_p9 }
  0x11   : > { %p145_p11 = scmp.eq.s32.totalorder %s142_s6, 0  ;;  %p1165_p12 = scmp.eq.s32.totalorder %s690_s23, 0 }
  0x12   : > { %p846_p13 = pneg %p1161_p10  ;;  %s188_s11 = sshll.u32 %s1263_s2, 4  ;;  %s189_s11 = int_to_ptr.hbm [resolvable:$true] %s188_s11 }
  0x13   : > { %s1175_s12 = scalar_select %p145_p11, %s1040_s17, %s147_s27  }
  0x14   : > { %s1062_s13 = smov [#allocation2]   ;;  %p847_p0 = pnand %p1165_p12, %p846_p13 }
  0x15   : > { %s190_s14 = sshll.u32 %s1062_s13, 4  ;;  %s1063_s24 = smov 128   ;;  %s191_s14 = int_to_ptr.vmem [resolvable:$true] %s190_s14 }
  0x16   : > { %s1064_s23 = smov 8   ;;  %222 = sbr.rel (%p1161_p10) target bundleno = 456 (0x1c8), region = 36 }
  0x17   : > { %849 = dma.hbm_to_vmem [thread:$0]  (!%p847_p0), %s189_s11, 3072, %s191_s14, [#allocation3], %s1063_s24, %s1063_s24, %s1064_s23  }
  0x1b   : > { %1023 = dma.done.wait (%p1165_p12), [#allocation3], 3072  }
  0x1c   : > { %1025 = vsyncadd (%p1165_p12), [#allocation3], 4294964224  ;;  %p253_p1 = scmp.lt.s32.totalorder %s1048_s19, 1  ;;  %s701_s27 = sshll.u32 %s1044_s18, 4  ;;  %vm282_vm0 = vcmask 130048   ;;  %vm322_vm1 = vcmask 1045504  }
  0x1d   : > { %s268_s10 = scalar_lea.vmem %s1261_s0, %s701_s27  ;;  %v798_v6 = vld [vmem:[#allocation2 + $0xb0] sm:$0xf]  ;;  %v838_v7 = vld [vmem:[#allocation2 + $0xb4] sm:$0xf0]  ;;  %v790_v9 = vld [vmem:[#allocation2 + $0xa0] sm:$0xf] }
  0x1e   : > { %s254_s28 = scalar_select %p253_p1, %s1048_s19, 1  ;;  %v269_v1 = vld [vmem:[%s268_s10] sm:$0xff]  ;;  %v270_v2 = vld [vmem:[%s268_s10 + $0x8] sm:$0xff]  ;;  %v271_v4 = vld [vmem:[%s268_s10 + $0x10] sm:$0x3]  ;;  %v799_v8 = vor.u32 %v838_v7, %v798_v6  ;;  %vm310_vm2 = vcmask 1046528  }
  0x1f   : > { %v272_v3 = vpack.c.bf16 %v270_v2, %v269_v1  ;;  %v273_v5 = vpack.c.bf16 %v271_v4, %v271_v4  ;;  %v836_v10 = vld [vmem:[#allocation2 + $0xa4] sm:$0xf0]  ;;  %v782_v12 = vld [vmem:[#allocation2 + $0x90] sm:$0xf]  ;;  %v834_v13 = vld [vmem:[#allocation2 + $0x94] sm:$0xf0] }
  0x20   : > { %s813_s5 = sshll.u32 %s254_s28, 3  ;;  %506 = vmatpush.bf16.msra.mxu2 %v799_v8  ;;  %v791_v11 = vor.u32 %v836_v10, %v790_v9  ;;  %v783_v14 = vor.u32 %v834_v13, %v782_v12  ;;  %v774_v15 = vld [vmem:[#allocation2 + $0x80] sm:$0xf]  ;;  %v832_v16 = vld [vmem:[#allocation2 + $0x84] sm:$0xf0]  ;;  %vm330_vm3 = vcmask 523264  }
  0x21   : > { %s257_s13 = scalar_lea.vmem %s1262_s1, %s813_s5  ;;  %v775_v17 = vor.u32 %v832_v16, %v774_v15  ;;  %v837_v18 = vld [vmem:[#allocation2 + $0xb4] sm:$0xf]  ;;  %v800_v19 = vld [vmem:[#allocation2 + $0xb8] sm:$0xf0]  ;;  %v835_v21 = vld [vmem:[#allocation2 + $0xa4] sm:$0xf] }
  0x22   : > { %v814_v0 = vld [vmem:[%s257_s13] sm:$0xff]  ;;  %v803_v20 = vor.u32 %v837_v18, %v800_v19  ;;  %v792_v22 = vld [vmem:[#allocation2 + $0xa8] sm:$0xf0]  ;;  %v833_v23 = vld [vmem:[#allocation2 + $0x94] sm:$0xf]  ;;  %s1065_s8 = smov 64  }
  0x23   : > { %296 = vmatpush.bf16.msra.mxu0 %v814_v0  ;;  %v795_v24 = vor.u32 %v835_v21, %v792_v22  ;;  %v784_v25 = vld [vmem:[#allocation2 + $0x98] sm:$0xf0]  ;;  %v831_v27 = vld [vmem:[#allocation2 + $0x84] sm:$0xf]  ;;  %v776_v28 = vld [vmem:[#allocation2 + $0x88] sm:$0xf0] }
  0x24   : > { %507 = vmatpush.bf16.msra.mxu2 %v791_v11  ;;  %v787_v26 = vor.u32 %v833_v23, %v784_v25  ;;  %v779_v29 = vor.u32 %v831_v27, %v776_v28  ;;  %v766_v31 = vld [vmem:[#allocation2 + $0x70] sm:$0xf]  ;;  %v830_v32 = vld [vmem:[#allocation2 + $0x74] sm:$0xf0]  ;;  %v829_v33 = vld [vmem:[#allocation2 + $0x74] sm:$0xf] }
  0x25   : > { %v767_v34 = vor.u32 %v830_v32, %v766_v31  ;;  %v768_v35 = vld [vmem:[#allocation2 + $0x78] sm:$0xf0]  ;;  %v758_v36 = vld [vmem:[#allocation2 + $0x60] sm:$0xf]  ;;  %v828_v37 = vld [vmem:[#allocation2 + $0x64] sm:$0xf0] }
  0x26   : > { %706 = vmatmul.msk.bf16.vlgmr.msra.gmra.mxu0 %vm282_vm0, %v272_v3  ;;  %v771_v39 = vor.u32 %v829_v33, %v768_v35  ;;  %v827_v40 = vld [vmem:[#allocation2 + $0x64] sm:$0xf]  ;;  %v760_v41 = vld [vmem:[#allocation2 + $0x68] sm:$0xf0]  ;;  %v759_v42 = vor.u32 %v828_v37, %v758_v36  ;;  %v750_v44 = vld [vmem:[#allocation2 + $0x50] sm:$0xf] }
  0x27   : > { %488 = vmatpush.bf16.msra.mxu1 %v767_v34  ;;  %v763_v43 = vor.u32 %v827_v40, %v760_v41  ;;  %v826_v45 = vld [vmem:[#allocation2 + $0x54] sm:$0xf0]  ;;  %v825_v46 = vld [vmem:[#allocation2 + $0x54] sm:$0xf]  ;;  %v752_v47 = vld [vmem:[#allocation2 + $0x58] sm:$0xf0] }
  0x28   : > { %508 = vmatpush.bf16.msra.mxu2 %v783_v14  ;;  %516 = vmatpush.bf16.msra.mxu3 %v771_v39  ;;  %v751_v48 = vor.u32 %v826_v45, %v750_v44  ;;  %v755_v50 = vor.u32 %v825_v46, %v752_v47  ;;  %v742_v51 = vld [vmem:[#allocation2 + $0x40] sm:$0xf]  ;;  %v824_v52 = vld [vmem:[#allocation2 + $0x44] sm:$0xf0]  ;;  %v823_v56 = vld [vmem:[#allocation2 + $0x44] sm:$0xf] }
  0x29   : > { %v744_v57 = vld [vmem:[#allocation2 + $0x48] sm:$0xf0]  ;;  %v743_v61 = vor.u32 %v824_v52, %v742_v51  ;;  %v734_v63 = vld [vmem:[#allocation2 + $0x30] sm:$0xf]  ;;  %v822_v0 = vld [vmem:[#allocation2 + $0x34] sm:$0xf0] }
  0x2a   : > { %v747_v4 = vor.u32 %v823_v56, %v744_v57  ;;  %v821_v7 = vld [vmem:[#allocation2 + $0x34] sm:$0xf]  ;;  %v736_v8 = vld [vmem:[#allocation2 + $0x38] sm:$0xf0]  ;;  %v735_v9 = vor.u32 %v822_v0, %v734_v63  ;;  %v726_v10 = vld [vmem:[#allocation2 + $0x20] sm:$0xf] }
  0x2b   : > { %489 = vmatpush.bf16.msra.mxu1 %v759_v42  ;;  %v820_v11 = vld [vmem:[#allocation2 + $0x24] sm:$0xf0]  ;;  %v739_v12 = vor.u32 %v821_v7, %v736_v8  ;;  %v819_v14 = vld [vmem:[#allocation2 + $0x24] sm:$0xf]  ;;  %v728_v15 = vld [vmem:[#allocation2 + $0x28] sm:$0xf0] }
  0x2c   : > { %509 = vmatpush.bf16.msra.mxu2 %v775_v17  ;;  %517 = vmatpush.bf16.msra.mxu3 %v763_v43  ;;  %v727_v16 = vor.u32 %v820_v11, %v726_v10  ;;  %v718_v17 = vld [vmem:[#allocation2 + $0x10] sm:$0xf]  ;;  %v818_v18 = vld [vmem:[#allocation2 + $0x14] sm:$0xf0]  ;;  %v731_v19 = vor.u32 %v819_v14, %v728_v15  ;;  %v720_v21 = vld [vmem:[#allocation2 + $0x18] sm:$0xf0] }
  0x2d   : > { %v719_v22 = vor.u32 %v818_v18, %v718_v17  ;;  %v816_v25 = vld [vmem:[#allocation2 + $0x4] sm:$0xf0]  ;;  %v712_v28 = vld [vmem:[#allocation2 + $0x8] sm:$0xf0]  ;;  %v359_v39 = vld [vmem:[%s1264_s3] sm:$0x3] }
  0x2e   : > { %v361_v41 = vperm.slane %v359_v39, 0  ;;  %s250_s23 = sand.u32 1, %s1036_s16   ;;  %v362_v44 = vperm.slane %v359_v39, 1  ;;  %s839_s28 = sshll.u32 %s1044_s18, 2 }
  0x2f   : > { %490 = vmatpush.bf16.msra.mxu1 %v751_v48  ;;  %s698_s27 = sshll.u32 %s250_s23, 5  ;;  %s809_s5 = sshll.u32 %s1048_s19, 3 }
  0x30   : > { %534 = vmatpush.bf16.msrb.mxu2 %v803_v20  ;;  %518 = vmatpush.bf16.msra.mxu3 %v755_v50  ;;  %v817_v20 = vld [vmem:[#allocation2 + $0x14] sm:$0xf]  ;;  %s575_s6 = sadd.s32 %s839_s28, %s809_s5  ;;  %s252_s9 = scalar_lea.vmem [#allocation5], %s698_s27 }
  0x31   : > { %v723_v23 = vor.u32 %v817_v20, %v720_v21  ;;  %s810_s10 = sshll.u32 %s575_s6, 3  ;;  %s578_s7 = sshll.u32 %s252_s9, 4  ;;  %s579_s7 = int_to_ptr.vmem [resolvable:$true] %s578_s7 }
  0x32   : > { %s577_s11 = scalar_lea.hbm %s1265_s4, %s810_s10  ;;  %s982_s5 = scalar_lea.hbm %s1265_s4, 128 }
  0x33   : > { %491 = vmatpush.bf16.msra.mxu1 %v743_v61  ;;  %s580_s13 = sshll.u32 %s577_s11, 4  ;;  %s581_s13 = int_to_ptr.hbm [resolvable:$true] %s580_s13 }
  0x34   : > { %535 = vmatpush.bf16.msrb.mxu2 %v795_v24  ;;  %519 = vmatpush.bf16.msra.mxu3 %v747_v4  ;;  %v710_v24 = vld [vmem:[#allocation2] sm:$0xf]  ;;  %s976_s14 = sshra.s32 %s581_s13, 4  ;;  %s977_s14 = int_to_ptr.hbm [resolvable:$true] %s976_s14 }
  0x35   : > { %v711_v27 = vor.u32 %v816_v25, %v710_v24  ;;  %s978_s24 = scalar_lea.hbm %s977_s14, 32  ;;  %p983_p6 = scmp.lt.s32.totalorder %s977_s14, %s1265_s4 }
  0x36   : > { %707 = vmatmul.msk.bf16.gmra.mxu0 %vm282_vm0, %v273_v5  ;;  %p979_p2 = scmp.ne.s32.totalorder %s977_s14, %s978_s24  ;;  %p984_p7 = scmp.lt.s32.totalorder %s982_s5, %s978_s24 }
  0x37   : > { %492 = vmatpush.bf16.msra.mxu1 %v735_v9 }
  0x38   : > { %536 = vmatpush.bf16.msrb.mxu2 %v787_v26  ;;  %520 = vmatpush.bf16.msra.mxu3 %v739_v12  ;;  %v815_v26 = vld [vmem:[#allocation2 + $0x4] sm:$0xf]  ;;  %p980_p4 = pnand %p979_p2, %p1145_p3  ;;  %p985_p9 = por %p984_p7, %p983_p6 }
  0x3a   : > { %p981_p5 = pneg %p980_p4 }
  0x3b   : > { %493 = vmatpush.bf16.msra.mxu1 %v727_v16 }
  0x3c   : > { %537 = vmatpush.bf16.msrb.mxu2 %v779_v29  ;;  %521 = vmatpush.bf16.msra.mxu3 %v731_v19  ;;  %v715_v29 = vor.u32 %v815_v26, %v712_v28  ;;  %p986_p10 = pnand %p985_p9, %p981_p5 }
  0x3f   : > { %494 = vmatpush.bf16.msra.mxu1 %v719_v22 }
  0x40   : > { %522 = vmatpush.bf16.msra.mxu3 %v723_v23 }
  0x43   : > { %495 = vmatpush.bf16.msra.mxu1 %v711_v27 }
  0x44   : > { %523 = vmatpush.bf16.msra.mxu3 %v715_v29 }
  0xa3   : > { %v1194_v30 = vpop.f32.mrf.mxu0 }
  0xa4   : > { %v323_v54 = vrot.slane %v1194_v30, 2  ;;  %v311_v58 = vrot.slane %v1194_v30, 1 }
  0xab   : > { %v1196_v38 = vpop.f32.mrf.mxu0 }
  0xac   : > { %v324_v49 = vrot.slane %v1196_v38, 2  ;;  %v312_v53 = vrot.slane %v1196_v38, 1 }
  0xae   : > { %v325_v62 = vsel %vm322_vm1, %v323_v54, %v324_v49  ;;  %v313_v2 = vsel %vm310_vm2, %v311_v58, %v312_v53 }
  0xb3   : > { %v303_v55 = vpop.f32.mrf.mxu0 }
  0xb4   : > { %v314_v59 = vrot.slane %v303_v55, 1  ;;  %v326_v60 = vrot.slane %v303_v55, 2 }
  0xb6   : > { %v327_v1 = vsel %vm322_vm1, %v324_v49, %v326_v60  ;;  %v315_v3 = vsel %vm310_vm2, %v312_v53, %v314_v59 }
  0xb7   : > { %v334_v5 = vpack.c.bf16 %v327_v1, %v325_v62  ;;  %v927_v6 = vpack.i.bf16 %v315_v3, %v313_v2 }
  0xb9   : > { %804 = vmatmul.msk.bf16.vlgmr.msra.gmra.mxu2 %vm330_vm3, %v334_v5  ;;  %928 = vrot.lane.b32.xlu0 %v927_v6, %s1065_s8  ;;  %s561_s8 = scalar_lea.sflag [#allocation4], %s250_s23 }
  0xbb   : > { %v305_v13 = vpop.f32.mrf.mxu0 }
  0xc9   : > { %805 = vmatmul.msk.bf16.vlgmr.msrb.gmra.mxu2 %vm330_vm3, %v334_v5 }
 0x12b   : > { %v929_v31 = vpop.permute.xlu0 %928 }
 0x12c   : > { %v931_v32 = vunpack.i.h.bf16 %v929_v31  ;;  %v930_v33 = vunpack.i.l.bf16 %v929_v31 }
 0x12e   : > { %v331_v34 = vsel %vm330_vm3, %v1194_v30, %v930_v33  ;;  %v332_v35 = vsel %vm330_vm3, %v1196_v38, %v931_v32 }
 0x12f   : > { %v333_v36 = vpack.c.bf16 %v332_v35, %v331_v34 }
 0x131   : > { %496 = vmatmul.bf16.vlgmr.msra.gmra.mxu1 %v333_v36  ;;  %524 = vmatmul.bf16.vlgmr.msra.gmra.mxu3 %v333_v36 }
 0x13c   : > { %v511_v37 = vpop.f32.mrf.mxu2 }
 0x144   : > { %v513_v40 = vpop.f32.mrf.mxu2 }
 0x14c   : > { %v539_v45 = vpop.f32.mrf.mxu2 }
 0x154   : > { %v541_v59 = vpop.f32.mrf.mxu2 }
 0x1ae   : > { %v497_v42 = vpop.f32.mrf.mxu1 }
 0x1af   : > { %v498_v43 = vadd.f32 %v497_v42, %v361_v41 }
 0x1b1   : > { %v512_v30 = vadd.f32 %v511_v37, %v498_v43 }
 0x1b3   : > { %vm544_vm4 = vcmp.gt.f32.partialorder %v512_v30, 0.0  ;;  %v548_v38 = vmul.f32 0.2, %v512_v30 }
 0x1b4   : > { %v525_v46 = vpop.f32.mrf.mxu3 }
 0x1b5   : > { %v552_v47 = vsel %vm544_vm4, %v512_v30, %v548_v38  ;;  %v526_v48 = vadd.f32 %v525_v46, %v362_v44 }
 0x1b6   : > { %556 = vst [vmem:[%s252_s9] sm:$0xff] %v552_v47  ;;  %v499_v49 = vpop.f32.mrf.mxu1 }
 0x1b7   : > { %v540_v50 = vadd.f32 %v539_v45, %v526_v48  ;;  %v500_v51 = vadd.f32 %v499_v49, %v361_v41 }
 0x1b9   : > { %vm545_vm5 = vcmp.gt.f32.partialorder %v540_v50, 0.0  ;;  %v549_v52 = vmul.f32 0.2, %v540_v50  ;;  %v514_v53 = vadd.f32 %v513_v40, %v500_v51 }
 0x1bb   : > { %v553_v54 = vsel %vm545_vm5, %v540_v50, %v549_v52  ;;  %vm546_vm6 = vcmp.gt.f32.partialorder %v514_v53, 0.0  ;;  %v550_v55 = vmul.f32 0.2, %v514_v53 }
 0x1bc   : > { %557 = vst [vmem:[%s252_s9 + $0x8] sm:$0xff] %v553_v54  ;;  %v527_v56 = vpop.f32.mrf.mxu3 }
 0x1bd   : > { %v554_v57 = vsel %vm546_vm6, %v514_v53, %v550_v55  ;;  %v528_v58 = vadd.f32 %v527_v56, %v362_v44 }
 0x1be   : > { %558 = vst [vmem:[%s252_s9 + $0x10] sm:$0xff] %v554_v57 }
 0x1bf   : > { %v542_v60 = vadd.f32 %v541_v59, %v528_v58 }
 0x1c1   : > { %vm547_vm7 = vcmp.gt.f32.partialorder %v542_v60, 0.0  ;;  %v551_v61 = vmul.f32 0.2, %v542_v60 }
 0x1c3   : > { %v555_v62 = vsel %vm547_vm7, %v542_v60, %v551_v61 }
 0x1c4   : > { %559 = vst [vmem:[%s252_s9 + $0x18] sm:$0xff] %v555_v62 }
 0x1c5   : > { %989 = shalt.err (!%p986_p10)
}
 0x1c6   : > { %s1066_s23 = smov 256   ;;  %s1067_s9 = smov 16  }
 0x1c7   : > { %844 = dma.vmem_to_hbm [thread:$0]  (%p1145_p3), %s579_s7, 512, %s581_s13, %s561_s8, %s1066_s23, %s1066_s23, %s1067_s9  }
 0x1c8 PF: > { %p856_p11 = scmp.ge.s32.totalorder %s1060_s22, 2  ;;  %s595_s18 = sand.u32 1, %s1032_s15  }
 0x1c9   : > { %s596_s19 = scalar_lea.sflag [#allocation4], %s595_s18 }
 0x1ca   : > { %p851_p12 = pnand %p856_p11, %p1154_p8 }
 0x1cc   : > { %p852_p13 = pneg %p851_p12 }
 0x1ce   : > { %1027 = dma.done.wait (%p852_p13), %s596_s19, 512  }
 0x1cf   : > { %1029 = vsyncadd (%p852_p13), %s596_s19, 4294966784  ;;  %s18_s22 = sadd.s32 1, %s1060_s22   ;;  %s1270_s15 = smov %s1036_s16 }
 0x1d0   : > { %p15_p0 = scmp.ge.s32.totalorder %s18_s22, 6   ;;  %s1271_s16 = smov %s1040_s17 }
 0x1d1   : > { %s1272_s17 = smov %s1175_s12  ;;  %s1273_s18 = smov %s1052_s20 }
 0x1d2   : > { %s1274_s19 = smov %s1056_s21  ;;  %s1275_s20 = smov %s1278_s25 }
 0x1d3   : > { %s1276_s21 = smov %s1282_s26  ;;  %17 = sbr.rel (!%p15_p0) target bundleno = 6 (0x6), region = 81 }
 0x1d8   :  { %602 = vsyncpa [#allocation3], 1 }
 0x1d9   :  { %604 = vsyncpa [#allocation3 + $0x1], 1 }
 0x1da   :  { %605 = vsyncpa [#allocation4], 1 }
 0x1db   :  { %607 = vsyncpa [#allocation4 + $0x1], 1 }

// kernel: tpu_custom_call.1
= control target key start
LH: loop header
LB: loop body
LE: loop exit
PB: predicated region body
PF: predicated region fallthrough
CT: control target
= control target key end

     0   :  { %9 = vsyncpa [#allocation3], 0  ;;  %s1261_s0 = inlined_call_operand.vmem [shape: f32[34,16], index: 0, kind: input, shape index: {}]   ;;  %s1262_s1 = inlined_call_operand.vmem [shape: bf16[2,16,64], index: 1, kind: input, shape index: {}]   ;;  %s1263_s2 = inlined_call_operand.hbm [shape: bf16[192,256], index: 2, kind: input, shape index: {}]   ;;  %s1264_s3 = inlined_call_operand.vmem [shape: f32[1,256], index: 3, kind: input, shape index: {}]   ;;  %s1265_s4 = inlined_call_operand.hbm [shape: f32[2,32,256], index: 4, kind: output, shape index: {}]  }
   0x1   :  { %10 = vsyncpa [#allocation4], 0 }
   0x2   :  { %12 = vsyncpa [#allocation4 + $0x1], 0  ;;  %s1093_s15 = smov 0   ;;  %s1095_s16 = smov 0  }
   0x3   :  { %s1097_s17 = smov 0   ;;  %s1099_s18 = smov 0  }
   0x4   :  { %s1101_s19 = smov 0   ;;  %s1103_s20 = smov 0  }
   0x5   :  { %s1105_s21 = smov 0   ;;  %s1107_s22 = smov 0  }
   0x6 LB: > { %s690_s23 = sadd.s32 4294967295, %s1060_s22   ;;  %s691_s24 = sadd.s32 4294967294, %s1060_s22   ;;  %s1060_s22 = sphi %s1107_s22, %s18_s22   ;;  %s1056_s21 = sphi %s1105_s21, %s1276_s21   ;;  %s1052_s20 = sphi %s1103_s20, %s1275_s20   ;;  %s1048_s19 = sphi %s1101_s19, %s1274_s19   ;;  %s1044_s18 = sphi %s1099_s18, %s1273_s18   ;;  %s1040_s17 = sphi %s1097_s17, %s1272_s17   ;;  %s1036_s16 = sphi %s1095_s16, %s1271_s16   ;;  %s1032_s15 = sphi %s1093_s15, %s1270_s15  }
   0x7   : > { %s30_s25 = sadd.s32 1, %s1052_s20  ;;  %s33_s26 = sadd.s32 1, %s1056_s21 }
   0x8   : > { %p31_p0 = scmp.ge.s32.totalorder %s30_s25, 2  ;;  %s147_s27 = sadd.s32 1, %s1040_s17 }
   0x9   : > { %p157_p1 = scmp.ne.s32.totalorder %s1040_s17, %s1036_s16  ;;  %p158_p2 = scmp.eq.s32.totalorder %s690_s23, 3 }
   0xa   : > { %s1278_s25 = smov (%p31_p0, %s30_s25), 0  ;;  %s1280_s26 = smov (!%p31_p0, %s33_s26), %s1056_s21 }
   0xb   : > { %s141_s28 = ssub.s32 %s1052_s20, %s1278_s25  ;;  %p1145_p3 = por %p158_p2, %p157_p1 }
   0xc   : > { %p35_p4 = scmp.ge.s32.totalorder %s1280_s26, 2  ;;  %p163_p5 = scmp.ne.s32.totalorder %s1036_s16, %s1032_s15 }
   0xd   : > { %p164_p6 = scmp.eq.s32.totalorder %s691_s24, 3  ;;  %p692_p7 = scmp.ge.s32.totalorder %s1060_s22, 1 }
   0xe   : > { %s1282_s26 = smov (%p35_p4, %s1280_s26), 0  ;;  %p171_p9 = scmp.lt.s32.totalorder %s1060_s22, 5 }
   0xf   : > { %p1154_p8 = por %p164_p6, %p163_p5  ;;  %s140_s5 = ssub.s32 %s1056_s21, %s1282_s26 }
  0x10   : > { %s142_s6 = sor.u32 %s141_s28, %s140_s5  ;;  %p1161_p10 = pnand %p692_p7, %p171_p9 }
  0x11   : > { %p145_p11 = scmp.eq.s32.totalorder %s142_s6, 0  ;;  %p1165_p12 = scmp.eq.s32.totalorder %s690_s23, 0 }
  0x12   : > { %p846_p13 = pneg %p1161_p10  ;;  %s188_s11 = sshll.u32 %s1263_s2, 4  ;;  %s189_s11 = int_to_ptr.hbm [resolvable:$true] %s188_s11 }
  0x13   : > { %s1175_s12 = scalar_select %p145_p11, %s1040_s17, %s147_s27  }
  0x14   : > { %s1062_s13 = smov [#allocation2]   ;;  %p847_p0 = pnand %p1165_p12, %p846_p13 }
  0x15   : > { %s190_s14 = sshll.u32 %s1062_s13, 4  ;;  %s1063_s24 = smov 128   ;;  %s191_s14 = int_to_ptr.vmem [resolvable:$true] %s190_s14 }
  0x16   : > { %s1064_s23 = smov 8   ;;  %222 = sbr.rel (%p1161_p10) target bundleno = 456 (0x1c8), region = 36 }
  0x17   : > { %849 = dma.hbm_to_vmem [thread:$0]  (!%p847_p0), %s189_s11, 3072, %s191_s14, [#allocation3], %s1063_s24, %s1063_s24, %s1064_s23  }
  0x1b   : > { %1023 = dma.done.wait (%p1165_p12), [#allocation3], 3072  }
  0x1c   : > { %1025 = vsyncadd (%p1165_p12), [#allocation3], 4294964224  ;;  %p253_p1 = scmp.lt.s32.totalorder %s1048_s19, 1  ;;  %s701_s27 = sshll.u32 %s1044_s18, 4  ;;  %vm282_vm0 = vcmask 130048   ;;  %vm322_vm1 = vcmask 1045504  }
  0x1d   : > { %s268_s10 = scalar_lea.vmem %s1261_s0, %s701_s27  ;;  %v798_v6 = vld [vmem:[#allocation2 + $0xb0] sm:$0xf]  ;;  %v838_v7 = vld [vmem:[#allocation2 + $0xb4] sm:$0xf0]  ;;  %v790_v9 = vld [vmem:[#allocation2 + $0xa0] sm:$0xf] }
  0x1e   : > { %s254_s28 = scalar_select %p253_p1, %s1048_s19, 1  ;;  %v269_v1 = vld [vmem:[%s268_s10] sm:$0xff]  ;;  %v270_v2 = vld [vmem:[%s268_s10 + $0x8] sm:$0xff]  ;;  %v271_v4 = vld [vmem:[%s268_s10 + $0x10] sm:$0x3]  ;;  %v799_v8 = vor.u32 %v838_v7, %v798_v6  ;;  %vm310_vm2 = vcmask 1046528  }
  0x1f   : > { %v272_v3 = vpack.c.bf16 %v270_v2, %v269_v1  ;;  %v273_v5 = vpack.c.bf16 %v271_v4, %v271_v4  ;;  %v836_v10 = vld [vmem:[#allocation2 + $0xa4] sm:$0xf0]  ;;  %v782_v12 = vld [vmem:[#allocation2 + $0x90] sm:$0xf]  ;;  %v834_v13 = vld [vmem:[#allocation2 + $0x94] sm:$0xf0] }
  0x20   : > { %s813_s5 = sshll.u32 %s254_s28, 3  ;;  %506 = vmatpush.bf16.msra.mxu2 %v799_v8  ;;  %v791_v11 = vor.u32 %v836_v10, %v790_v9  ;;  %v783_v14 = vor.u32 %v834_v13, %v782_v12  ;;  %v774_v15 = vld [vmem:[#allocation2 + $0x80] sm:$0xf]  ;;  %v832_v16 = vld [vmem:[#allocation2 + $0x84] sm:$0xf0]  ;;  %vm330_vm3 = vcmask 523264  }
  0x21   : > { %s257_s13 = scalar_lea.vmem %s1262_s1, %s813_s5  ;;  %v775_v17 = vor.u32 %v832_v16, %v774_v15  ;;  %v837_v18 = vld [vmem:[#allocation2 + $0xb4] sm:$0xf]  ;;  %v800_v19 = vld [vmem:[#allocation2 + $0xb8] sm:$0xf0]  ;;  %v835_v21 = vld [vmem:[#allocation2 + $0xa4] sm:$0xf] }
  0x22   : > { %v814_v0 = vld [vmem:[%s257_s13] sm:$0xff]  ;;  %v803_v20 = vor.u32 %v837_v18, %v800_v19  ;;  %v792_v22 = vld [vmem:[#allocation2 + $0xa8] sm:$0xf0]  ;;  %v833_v23 = vld [vmem:[#allocation2 + $0x94] sm:$0xf]  ;;  %s1065_s8 = smov 64  }
  0x23   : > { %296 = vmatpush.bf16.msra.mxu0 %v814_v0  ;;  %v795_v24 = vor.u32 %v835_v21, %v792_v22  ;;  %v784_v25 = vld [vmem:[#allocation2 + $0x98] sm:$0xf0]  ;;  %v831_v27 = vld [vmem:[#allocation2 + $0x84] sm:$0xf]  ;;  %v776_v28 = vld [vmem:[#allocation2 + $0x88] sm:$0xf0] }
  0x24   : > { %507 = vmatpush.bf16.msra.mxu2 %v791_v11  ;;  %v787_v26 = vor.u32 %v833_v23, %v784_v25  ;;  %v779_v29 = vor.u32 %v831_v27, %v776_v28  ;;  %v766_v31 = vld [vmem:[#allocation2 + $0x70] sm:$0xf]  ;;  %v830_v32 = vld [vmem:[#allocation2 + $0x74] sm:$0xf0]  ;;  %v829_v33 = vld [vmem:[#allocation2 + $0x74] sm:$0xf] }
  0x25   : > { %v767_v34 = vor.u32 %v830_v32, %v766_v31  ;;  %v768_v35 = vld [vmem:[#allocation2 + $0x78] sm:$0xf0]  ;;  %v758_v36 = vld [vmem:[#allocation2 + $0x60] sm:$0xf]  ;;  %v828_v37 = vld [vmem:[#allocation2 + $0x64] sm:$0xf0] }
  0x26   : > { %706 = vmatmul.msk.bf16.vlgmr.msra.gmra.mxu0 %vm282_vm0, %v272_v3  ;;  %v771_v39 = vor.u32 %v829_v33, %v768_v35  ;;  %v827_v40 = vld [vmem:[#allocation2 + $0x64] sm:$0xf]  ;;  %v760_v41 = vld [vmem:[#allocation2 + $0x68] sm:$0xf0]  ;;  %v759_v42 = vor.u32 %v828_v37, %v758_v36  ;;  %v750_v44 = vld [vmem:[#allocation2 + $0x50] sm:$0xf] }
  0x27   : > { %488 = vmatpush.bf16.msra.mxu1 %v767_v34  ;;  %v763_v43 = vor.u32 %v827_v40, %v760_v41  ;;  %v826_v45 = vld [vmem:[#allocation2 + $0x54] sm:$0xf0]  ;;  %v825_v46 = vld [vmem:[#allocation2 + $0x54] sm:$0xf]  ;;  %v752_v47 = vld [vmem:[#allocation2 + $0x58] sm:$0xf0] }
  0x28   : > { %508 = vmatpush.bf16.msra.mxu2 %v783_v14  ;;  %516 = vmatpush.bf16.msra.mxu3 %v771_v39  ;;  %v751_v48 = vor.u32 %v826_v45, %v750_v44  ;;  %v755_v50 = vor.u32 %v825_v46, %v752_v47  ;;  %v742_v51 = vld [vmem:[#allocation2 + $0x40] sm:$0xf]  ;;  %v824_v52 = vld [vmem:[#allocation2 + $0x44] sm:$0xf0]  ;;  %v823_v56 = vld [vmem:[#allocation2 + $0x44] sm:$0xf] }
  0x29   : > { %v744_v57 = vld [vmem:[#allocation2 + $0x48] sm:$0xf0]  ;;  %v743_v61 = vor.u32 %v824_v52, %v742_v51  ;;  %v734_v63 = vld [vmem:[#allocation2 + $0x30] sm:$0xf]  ;;  %v822_v0 = vld [vmem:[#allocation2 + $0x34] sm:$0xf0] }
  0x2a   : > { %v747_v4 = vor.u32 %v823_v56, %v744_v57  ;;  %v821_v7 = vld [vmem:[#allocation2 + $0x34] sm:$0xf]  ;;  %v736_v8 = vld [vmem:[#allocation2 + $0x38] sm:$0xf0]  ;;  %v735_v9 = vor.u32 %v822_v0, %v734_v63  ;;  %v726_v10 = vld [vmem:[#allocation2 + $0x20] sm:$0xf] }
  0x2b   : > { %489 = vmatpush.bf16.msra.mxu1 %v759_v42  ;;  %v820_v11 = vld [vmem:[#allocation2 + $0x24] sm:$0xf0]  ;;  %v739_v12 = vor.u32 %v821_v7, %v736_v8  ;;  %v819_v14 = vld [vmem:[#allocation2 + $0x24] sm:$0xf]  ;;  %v728_v15 = vld [vmem:[#allocation2 + $0x28] sm:$0xf0] }
  0x2c   : > { %509 = vmatpush.bf16.msra.mxu2 %v775_v17  ;;  %517 = vmatpush.bf16.msra.mxu3 %v763_v43  ;;  %v727_v16 = vor.u32 %v820_v11, %v726_v10  ;;  %v718_v17 = vld [vmem:[#allocation2 + $0x10] sm:$0xf]  ;;  %v818_v18 = vld [vmem:[#allocation2 + $0x14] sm:$0xf0]  ;;  %v731_v19 = vor.u32 %v819_v14, %v728_v15  ;;  %v720_v21 = vld [vmem:[#allocation2 + $0x18] sm:$0xf0] }
  0x2d   : > { %v719_v22 = vor.u32 %v818_v18, %v718_v17  ;;  %v816_v25 = vld [vmem:[#allocation2 + $0x4] sm:$0xf0]  ;;  %v712_v28 = vld [vmem:[#allocation2 + $0x8] sm:$0xf0]  ;;  %v359_v39 = vld [vmem:[%s1264_s3] sm:$0x3] }
  0x2e   : > { %v361_v41 = vperm.slane %v359_v39, 0  ;;  %s250_s23 = sand.u32 1, %s1036_s16   ;;  %v362_v44 = vperm.slane %v359_v39, 1  ;;  %s839_s28 = sshll.u32 %s1044_s18, 2 }
  0x2f   : > { %490 = vmatpush.bf16.msra.mxu1 %v751_v48  ;;  %s698_s27 = sshll.u32 %s250_s23, 5  ;;  %s809_s5 = sshll.u32 %s1048_s19, 3 }
  0x30   : > { %534 = vmatpush.bf16.msrb.mxu2 %v803_v20  ;;  %518 = vmatpush.bf16.msra.mxu3 %v755_v50  ;;  %v817_v20 = vld [vmem:[#allocation2 + $0x14] sm:$0xf]  ;;  %s575_s6 = sadd.s32 %s839_s28, %s809_s5  ;;  %s252_s9 = scalar_lea.vmem [#allocation5], %s698_s27 }
  0x31   : > { %v723_v23 = vor.u32 %v817_v20, %v720_v21  ;;  %s810_s10 = sshll.u32 %s575_s6, 3  ;;  %s578_s7 = sshll.u32 %s252_s9, 4  ;;  %s579_s7 = int_to_ptr.vmem [resolvable:$true] %s578_s7 }
  0x32   : > { %s577_s11 = scalar_lea.hbm %s1265_s4, %s810_s10  ;;  %s982_s5 = scalar_lea.hbm %s1265_s4, 128 }
  0x33   : > { %491 = vmatpush.bf16.msra.mxu1 %v743_v61  ;;  %s580_s13 = sshll.u32 %s577_s11, 4  ;;  %s581_s13 = int_to_ptr.hbm [resolvable:$true] %s580_s13 }
  0x34   : > { %535 = vmatpush.bf16.msrb.mxu2 %v795_v24  ;;  %519 = vmatpush.bf16.msra.mxu3 %v747_v4  ;;  %v710_v24 = vld [vmem:[#allocation2] sm:$0xf]  ;;  %s976_s14 = sshra.s32 %s581_s13, 4  ;;  %s977_s14 = int_to_ptr.hbm [resolvable:$true] %s976_s14 }
  0x35   : > { %v711_v27 = vor.u32 %v816_v25, %v710_v24  ;;  %s978_s24 = scalar_lea.hbm %s977_s14, 32  ;;  %p983_p6 = scmp.lt.s32.totalorder %s977_s14, %s1265_s4 }
  0x36   : > { %707 = vmatmul.msk.bf16.gmra.mxu0 %vm282_vm0, %v273_v5  ;;  %p979_p2 = scmp.ne.s32.totalorder %s977_s14, %s978_s24  ;;  %p984_p7 = scmp.lt.s32.totalorder %s982_s5, %s978_s24 }
  0x37   : > { %492 = vmatpush.bf16.msra.mxu1 %v735_v9 }
  0x38   : > { %536 = vmatpush.bf16.msrb.mxu2 %v787_v26  ;;  %520 = vmatpush.bf16.msra.mxu3 %v739_v12  ;;  %v815_v26 = vld [vmem:[#allocation2 + $0x4] sm:$0xf]  ;;  %p980_p4 = pnand %p979_p2, %p1145_p3  ;;  %p985_p9 = por %p984_p7, %p983_p6 }
  0x3a   : > { %p981_p5 = pneg %p980_p4 }
  0x3b   : > { %493 = vmatpush.bf16.msra.mxu1 %v727_v16 }
  0x3c   : > { %537 = vmatpush.bf16.msrb.mxu2 %v779_v29  ;;  %521 = vmatpush.bf16.msra.mxu3 %v731_v19  ;;  %v715_v29 = vor.u32 %v815_v26, %v712_v28  ;;  %p986_p10 = pnand %p985_p9, %p981_p5 }
  0x3f   : > { %494 = vmatpush.bf16.msra.mxu1 %v719_v22 }
  0x40   : > { %522 = vmatpush.bf16.msra.mxu3 %v723_v23 }
  0x43   : > { %495 = vmatpush.bf16.msra.mxu1 %v711_v27 }
  0x44   : > { %523 = vmatpush.bf16.msra.mxu3 %v715_v29 }
  0xa3   : > { %v1194_v30 = vpop.f32.mrf.mxu0 }
  0xa4   : > { %v323_v54 = vrot.slane %v1194_v30, 2  ;;  %v311_v58 = vrot.slane %v1194_v30, 1 }
  0xab   : > { %v1196_v38 = vpop.f32.mrf.mxu0 }
  0xac   : > { %v324_v49 = vrot.slane %v1196_v38, 2  ;;  %v312_v53 = vrot.slane %v1196_v38, 1 }
  0xae   : > { %v325_v62 = vsel %vm322_vm1, %v323_v54, %v324_v49  ;;  %v313_v2 = vsel %vm310_vm2, %v311_v58, %v312_v53 }
  0xb3   : > { %v303_v55 = vpop.f32.mrf.mxu0 }
  0xb4   : > { %v314_v59 = vrot.slane %v303_v55, 1  ;;  %v326_v60 = vrot.slane %v303_v55, 2 }
  0xb6   : > { %v327_v1 = vsel %vm322_vm1, %v324_v49, %v326_v60  ;;  %v315_v3 = vsel %vm310_vm2, %v312_v53, %v314_v59 }
  0xb7   : > { %v334_v5 = vpack.c.bf16 %v327_v1, %v325_v62  ;;  %v927_v6 = vpack.i.bf16 %v315_v3, %v313_v2 }
  0xb9   : > { %804 = vmatmul.msk.bf16.vlgmr.msra.gmra.mxu2 %vm330_vm3, %v334_v5  ;;  %928 = vrot.lane.b32.xlu0 %v927_v6, %s1065_s8  ;;  %s561_s8 = scalar_lea.sflag [#allocation4], %s250_s23 }
  0xbb   : > { %v305_v13 = vpop.f32.mrf.mxu0 }
  0xc9   : > { %805 = vmatmul.msk.bf16.vlgmr.msrb.gmra.mxu2 %vm330_vm3, %v334_v5 }
 0x12b   : > { %v929_v31 = vpop.permute.xlu0 %928 }
 0x12c   : > { %v931_v32 = vunpack.i.h.bf16 %v929_v31  ;;  %v930_v33 = vunpack.i.l.bf16 %v929_v31 }
 0x12e   : > { %v331_v34 = vsel %vm330_vm3, %v1194_v30, %v930_v33  ;;  %v332_v35 = vsel %vm330_vm3, %v1196_v38, %v931_v32 }
 0x12f   : > { %v333_v36 = vpack.c.bf16 %v332_v35, %v331_v34 }
 0x131   : > { %496 = vmatmul.bf16.vlgmr.msra.gmra.mxu1 %v333_v36  ;;  %524 = vmatmul.bf16.vlgmr.msra.gmra.mxu3 %v333_v36 }
 0x13c   : > { %v511_v37 = vpop.f32.mrf.mxu2 }
 0x144   : > { %v513_v40 = vpop.f32.mrf.mxu2 }
 0x14c   : > { %v539_v45 = vpop.f32.mrf.mxu2 }
 0x154   : > { %v541_v59 = vpop.f32.mrf.mxu2 }
 0x1ae   : > { %v497_v42 = vpop.f32.mrf.mxu1 }
 0x1af   : > { %v498_v43 = vadd.f32 %v497_v42, %v361_v41 }
 0x1b1   : > { %v512_v30 = vadd.f32 %v511_v37, %v498_v43 }
 0x1b3   : > { %vm544_vm4 = vcmp.gt.f32.partialorder %v512_v30, 0.0  ;;  %v548_v38 = vmul.f32 0.2, %v512_v30 }
 0x1b4   : > { %v525_v46 = vpop.f32.mrf.mxu3 }
 0x1b5   : > { %v552_v47 = vsel %vm544_vm4, %v512_v30, %v548_v38  ;;  %v526_v48 = vadd.f32 %v525_v46, %v362_v44 }
 0x1b6   : > { %556 = vst [vmem:[%s252_s9] sm:$0xff] %v552_v47  ;;  %v499_v49 = vpop.f32.mrf.mxu1 }
 0x1b7   : > { %v540_v50 = vadd.f32 %v539_v45, %v526_v48  ;;  %v500_v51 = vadd.f32 %v499_v49, %v361_v41 }
 0x1b9   : > { %vm545_vm5 = vcmp.gt.f32.partialorder %v540_v50, 0.0  ;;  %v549_v52 = vmul.f32 0.2, %v540_v50  ;;  %v514_v53 = vadd.f32 %v513_v40, %v500_v51 }
 0x1bb   : > { %v553_v54 = vsel %vm545_vm5, %v540_v50, %v549_v52  ;;  %vm546_vm6 = vcmp.gt.f32.partialorder %v514_v53, 0.0  ;;  %v550_v55 = vmul.f32 0.2, %v514_v53 }
 0x1bc   : > { %557 = vst [vmem:[%s252_s9 + $0x8] sm:$0xff] %v553_v54  ;;  %v527_v56 = vpop.f32.mrf.mxu3 }
 0x1bd   : > { %v554_v57 = vsel %vm546_vm6, %v514_v53, %v550_v55  ;;  %v528_v58 = vadd.f32 %v527_v56, %v362_v44 }
 0x1be   : > { %558 = vst [vmem:[%s252_s9 + $0x10] sm:$0xff] %v554_v57 }
 0x1bf   : > { %v542_v60 = vadd.f32 %v541_v59, %v528_v58 }
 0x1c1   : > { %vm547_vm7 = vcmp.gt.f32.partialorder %v542_v60, 0.0  ;;  %v551_v61 = vmul.f32 0.2, %v542_v60 }
 0x1c3   : > { %v555_v62 = vsel %vm547_vm7, %v542_v60, %v551_v61 }
 0x1c4   : > { %559 = vst [vmem:[%s252_s9 + $0x18] sm:$0xff] %v555_v62 }
 0x1c5   : > { %989 = shalt.err (!%p986_p10)
}
 0x1c6   : > { %s1066_s23 = smov 256   ;;  %s1067_s9 = smov 16  }
 0x1c7   : > { %844 = dma.vmem_to_hbm [thread:$0]  (%p1145_p3), %s579_s7, 512, %s581_s13, %s561_s8, %s1066_s23, %s1066_s23, %s1067_s9  }
 0x1c8 PF: > { %p856_p11 = scmp.ge.s32.totalorder %s1060_s22, 2  ;;  %s595_s18 = sand.u32 1, %s1032_s15  }
 0x1c9   : > { %s596_s19 = scalar_lea.sflag [#allocation4], %s595_s18 }
 0x1ca   : > { %p851_p12 = pnand %p856_p11, %p1154_p8 }
 0x1cc   : > { %p852_p13 = pneg %p851_p12 }
 0x1ce   : > { %1027 = dma.done.wait (%p852_p13), %s596_s19, 512  }
 0x1cf   : > { %1029 = vsyncadd (%p852_p13), %s596_s19, 4294966784  ;;  %s18_s22 = sadd.s32 1, %s1060_s22   ;;  %s1270_s15 = smov %s1036_s16 }
 0x1d0   : > { %p15_p0 = scmp.ge.s32.totalorder %s18_s22, 6   ;;  %s1271_s16 = smov %s1040_s17 }
 0x1d1   : > { %s1272_s17 = smov %s1175_s12  ;;  %s1273_s18 = smov %s1052_s20 }
 0x1d2   : > { %s1274_s19 = smov %s1056_s21  ;;  %s1275_s20 = smov %s1278_s25 }
 0x1d3   : > { %s1276_s21 = smov %s1282_s26  ;;  %17 = sbr.rel (!%p15_p0) target bundleno = 6 (0x6), region = 81 }
 0x1d8   :  { %602 = vsyncpa [#allocation3], 1 }
 0x1d9   :  { %604 = vsyncpa [#allocation3 + $0x1], 1 }
 0x1da   :  { %605 = vsyncpa [#allocation4], 1 }
 0x1db   :  { %607 = vsyncpa [#allocation4 + $0x1], 1 }

</bundles_post_ra>
